<compile_context>
chip_gen: v6e
topology: v6e:2x2x1
jax: 0.10.0
libtpu: 0.0.40
codegen_flags: <defaults>
</compile_context>

<pallas_src>
import jax
import jax.numpy as jnp
from jax.experimental import pallas as pl
from jax.experimental.pallas import tpu as pltpu


def _adagn_kernel(x_ref, emb_ref, w_ref, b_ref, o_ref):
    """One batch element per grid step.

    x_ref:   (C, S)   activation tile (batch dim squeezed)
    emb_ref: (1, E)   this batch element's embedding row
    w_ref:   (2C, E)  PyTorch Linear weight (used as-is)
    b_ref:   (2C, 1)  Linear bias as a column
    o_ref:   (C, S)   output tile
    """
    C = x_ref.shape[0]
    x = x_ref[...]                                    # (C, S)
    emb = emb_ref[...]                                # (1, E)

    # ada = W @ emb^T + b  computed as broadcast-multiply + lane reduction so
    # the result lands directly in column orientation (2C, 1).
    ada = jnp.sum(w_ref[...] * emb, axis=1, keepdims=True) + b_ref[...]
    ada = ada * jax.nn.sigmoid(ada)                   # SiLU

    scale = ada[:C, :]                                # (C, 1) -> broadcast over lanes
    shift = ada[C:, :]                                # (C, 1)

    o_ref[...] = (x * (1.0 + scale) + shift).astype(o_ref.dtype)


def adagn_forward(x_nchw, embed, weight, bias):
    """x_nchw: (B, C, H, W); embed: (B, E); weight: (2C, E); bias: (2C,)."""
    B, C, H, W = x_nchw.shape
    S = H * W
    E = embed.shape[1]

    x_bcs = x_nchw.reshape(B, C, S)        # pure reshape, no transpose / HBM shuffle
    emb_3d = embed.reshape(B, 1, E)        # so the per-batch block equals full last-two dims
    b_col = bias.reshape(2 * C, 1)

    out_bcs = pl.pallas_call(
        _adagn_kernel,
        out_shape=jax.ShapeDtypeStruct((B, C, S), x_nchw.dtype),
        grid=(B,),
        in_specs=[
            pl.BlockSpec((None, C, S), lambda b: (b, 0, 0)),    # x: one (C, S) tile per batch
            pl.BlockSpec((None, 1, E), lambda b: (b, 0, 0)),    # embed row for this batch
            pl.BlockSpec((2 * C, E), lambda b: (0, 0)),         # Linear weight (resident)
            pl.BlockSpec((2 * C, 1), lambda b: (0, 0)),         # Linear bias (resident)
        ],
        out_specs=pl.BlockSpec((None, C, S), lambda b: (b, 0, 0)),
        compiler_params=pltpu.CompilerParams(dimension_semantics=("parallel",)),
    )(x_bcs, emb_3d, weight, b_col)

    return out_bcs.reshape(B, C, H, W)


def adagn_reference(x, embed, weight, bias):
    """Pure-JAX reference mirroring the PyTorch forward."""
    C = x.shape[1]
    ss = embed @ weight.T + bias
    ss = ss * jax.nn.sigmoid(ss)                      # SiLU
    scale = ss[:, :C][:, :, None, None]
    shift = ss[:, C:][:, :, None, None]
    return x * (1.0 + scale) + shift


if __name__ == "__main__":
    # Small shapes consistent with the module (in_channels, embed_dim=128).
    B, C, H, W = 2, 16, 16, 16
    E = 128

    key = jax.random.PRNGKey(0)
    k0, k1, k2, k3 = jax.random.split(key, 4)
    x = jax.random.normal(k0, (B, C, H, W), jnp.float32)
    embed = jax.random.normal(k1, (B, E), jnp.float32)

    # The original module zero-initializes the Linear; use small nonzero values
    # so the scale/shift path is actually exercised (forward math is identical).
    weight = 0.1 * jax.random.normal(k2, (2 * C, E), jnp.float32)
    bias = 0.1 * jax.random.normal(k3, (2 * C,), jnp.float32)

    # Note: the module's num_groups argument is unused in its forward (no
    # GroupNorm op appears), so there is nothing additional to translate.

    out = adagn_forward(x, embed, weight, bias)
    out = jax.block_until_ready(out)

    ref = adagn_reference(x, embed, weight, bias)
    assert out.shape == (B, C, H, W)
    err = float(jnp.max(jnp.abs(out - ref)))
    assert jnp.allclose(out, ref, atol=1e-4, rtol=1e-4), f"max abs err = {err}"
    print("KERNEL_OK")
</pallas_src>

<mosaic_0001>
module attributes {stable_mosaic.version = 11 : i64} {
  func.func @_adagn_kernel(%arg0: i32, %arg1: memref<1x16x256xf32, #tpu.memory_space<vmem>>, %arg2: memref<1x1x128xf32, #tpu.memory_space<vmem>>, %arg3: memref<32x128xf32, #tpu.memory_space<vmem>>, %arg4: memref<32x1xf32, #tpu.memory_space<vmem>>, %arg5: memref<1x16x256xf32, #tpu.memory_space<vmem>>) attributes {dimension_semantics = [#tpu.dimension_semantics<parallel>], iteration_bounds = array<i64: 2>, scalar_prefetch = 0 : i64, scratch_operands = 0 : i64, tpu.core_type = #tpu.core_type<tc>, window_params = [{transform_indices = @transform_0, window_bounds = array<i64: 1, 16, 256>}, {transform_indices = @transform_1, window_bounds = array<i64: 1, 1, 128>}, {pipeline_mode = #tpu.pipeline_mode<synchronous>, transform_indices = @transform_2, window_bounds = array<i64: 32, 128>}, {pipeline_mode = #tpu.pipeline_mode<synchronous>, transform_indices = @transform_3, window_bounds = array<i64: 32, 1>}, {transform_indices = @transform_4, window_bounds = array<i64: 1, 16, 256>}]} {
    %c0 = arith.constant 0 : index
    %c0_0 = arith.constant 0 : index
    %c0_1 = arith.constant 0 : index
    %0 = vector.load %arg1[%c0, %c0_0, %c0_1] : memref<1x16x256xf32, #tpu.memory_space<vmem>>, vector<1x16x256xf32>
    %1 = vector.shape_cast %0 : vector<1x16x256xf32> to vector<16x256xf32>
    %c0_2 = arith.constant 0 : index
    %c0_3 = arith.constant 0 : index
    %c0_4 = arith.constant 0 : index
    %2 = vector.load %arg2[%c0_2, %c0_3, %c0_4] : memref<1x1x128xf32, #tpu.memory_space<vmem>>, vector<1x1x128xf32>
    %3 = vector.shape_cast %2 : vector<1x1x128xf32> to vector<1x128xf32>
    %c0_5 = arith.constant 0 : index
    %c0_6 = arith.constant 0 : index
    %4 = vector.load %arg3[%c0_5, %c0_6] : memref<32x128xf32, #tpu.memory_space<vmem>>, vector<32x128xf32>
    %5 = vector.broadcast %3 : vector<1x128xf32> to vector<32x128xf32>
    %6 = arith.mulf %4, %5 : vector<32x128xf32>
    %cst = arith.constant dense<0.000000e+00> : vector<32xf32>
    %7 = vector.multi_reduction <add>, %6, %cst [1] : vector<32x128xf32> to vector<32xf32>
    %8 = vector.shape_cast %7 : vector<32xf32> to vector<32x1xf32>
    %c0_7 = arith.constant 0 : index
    %c0_8 = arith.constant 0 : index
    %9 = vector.load %arg4[%c0_7, %c0_8] : memref<32x1xf32, #tpu.memory_space<vmem>>, vector<32x1xf32>
    %10 = arith.addf %8, %9 : vector<32x1xf32>
    %11 = arith.negf %10 : vector<32x1xf32>
    %12 = math.exp %11 : vector<32x1xf32>
    %cst_9 = arith.constant 1.000000e+00 : f32
    %13 = vector.broadcast %cst_9 : f32 to vector<32x1xf32>
    %14 = arith.addf %13, %12 : vector<32x1xf32>
    %15 = arith.divf %13, %14 : vector<32x1xf32>
    %16 = arith.mulf %10, %15 : vector<32x1xf32>
    %17 = vector.extract_strided_slice %16 {offsets = [0, 0], sizes = [16, 1], strides = [1, 1]} : vector<32x1xf32> to vector<16x1xf32>
    %18 = vector.extract_strided_slice %16 {offsets = [16, 0], sizes = [16, 1], strides = [1, 1]} : vector<32x1xf32> to vector<16x1xf32>
    %cst_10 = arith.constant 1.000000e+00 : f32
    %19 = vector.broadcast %cst_10 : f32 to vector<16x1xf32>
    %20 = arith.addf %19, %17 : vector<16x1xf32>
    %21 = vector.broadcast %20 : vector<16x1xf32> to vector<16x256xf32>
    %22 = arith.mulf %1, %21 : vector<16x256xf32>
    %23 = vector.broadcast %18 : vector<16x1xf32> to vector<16x256xf32>
    %24 = arith.addf %22, %23 : vector<16x256xf32>
    %c0_11 = arith.constant 0 : index
    %c0_12 = arith.constant 0 : index
    %c0_13 = arith.constant 0 : index
    %25 = vector.load %arg5[%c0_11, %c0_12, %c0_13] : memref<1x16x256xf32, #tpu.memory_space<vmem>>, vector<1x16x256xf32>
    %26 = vector.shape_cast %25 : vector<1x16x256xf32> to vector<16x256xf32>
    %27 = vector.shape_cast %24 : vector<16x256xf32> to vector<1x16x256xf32>
    tpu.vector_store %arg5[%c0_11, %c0_12, %c0_13], %27 {strides = array<i32>} : memref<1x16x256xf32, #tpu.memory_space<vmem>>, vector<1x16x256xf32>,
    return
  }
  func.func @transform_0(%arg0: i32) -> (i32, i32, i32) {
    %c0_i32 = arith.constant 0 : i32
    %c0_i32_0 = arith.constant 0 : i32
    %c0_i32_1 = arith.constant 0 : i32
    return %arg0, %c0_i32, %c0_i32_0 : i32, i32, i32
  }
  func.func @transform_1(%arg0: i32) -> (i32, i32, i32) {
    %c0_i32 = arith.constant 0 : i32
    %c0_i32_0 = arith.constant 0 : i32
    %c0_i32_1 = arith.constant 0 : i32
    return %arg0, %c0_i32, %c0_i32_0 : i32, i32, i32
  }
  func.func @transform_2(%arg0: i32) -> (i32, i32) {
    %c0_i32 = arith.constant 0 : i32
    %c0_i32_0 = arith.constant 0 : i32
    %c0_i32_1 = arith.constant 0 : i32
    return %c0_i32, %c0_i32_0 : i32, i32
  }
  func.func @transform_3(%arg0: i32) -> (i32, i32) {
    %c0_i32 = arith.constant 0 : i32
    %c0_i32_0 = arith.constant 0 : i32
    %c0_i32_1 = arith.constant 0 : i32
    return %c0_i32, %c0_i32_0 : i32, i32
  }
  func.func @transform_4(%arg0: i32) -> (i32, i32, i32) {
    %c0_i32 = arith.constant 0 : i32
    %c0_i32_0 = arith.constant 0 : i32
    %c0_i32_1 = arith.constant 0 : i32
    return %arg0, %c0_i32, %c0_i32_0 : i32, i32, i32
  }
}

</mosaic_0001>

<bundles_post_ra>
// kernel: tpu_custom_call.1
= control target key start
LH: loop header
LB: loop body
LE: loop exit
PB: predicated region body
PF: predicated region fallthrough
CT: control target
= control target key end

     0   :  { %9 = vsyncpa [#allocation3], 0  ;;  %s832_s0 = inlined_call_operand.hbm [shape: f32[2,16,256], index: 0, kind: input, shape index: {}]   ;;  %s833_s1 = inlined_call_operand.vmem [shape: f32[2,1,128], index: 1, kind: input, shape index: {}]   ;;  %s834_s2 = inlined_call_operand.vmem [shape: f32[32,128], index: 2, kind: input, shape index: {}]   ;;  %s835_s3 = inlined_call_operand.vmem [shape: f32[32,1], index: 3, kind: input, shape index: {}]   ;;  %s836_s4 = inlined_call_operand.hbm [shape: f32[2,16,256], index: 4, kind: output, shape index: {}]  }
   0x1   :  { %11 = vsyncpa [#allocation3 + $0x1], 0 }
   0x2   :  { %12 = vsyncpa [#allocation4], 0 }
   0x3   :  { %14 = vsyncpa [#allocation4 + $0x1], 0  ;;  %s639_s15 = smov 0   ;;  %s641_s16 = smov 0  }
   0x4   :  { %s643_s17 = smov 0   ;;  %s645_s18 = smov 0  }
   0x5 LB: > { %s660_s19 = sadd.s32 4294967295, %s605_s18   ;;  %s423_s20 = sadd.s32 4294967294, %s605_s18   ;;  %s605_s18 = sphi %s645_s18, %s851_s18   ;;  %s601_s17 = sphi %s643_s17, %s850_s17   ;;  %s597_s16 = sphi %s641_s16, %s849_s16   ;;  %s593_s15 = sphi %s639_s15, %s848_s15  }
   0x6   : > { %s664_s21 = sadd.s32 1, %s605_s18   ;;  %s27_s22 = sadd.s32 1, %s601_s17 }
   0x7   : > { %s24_s23 = ssub.s32 %s605_s18, %s664_s21  ;;  %p34_p0 = scmp.ne.s32.totalorder %s601_s17, %s597_s16 }
   0x8   : > { %p25_p1 = scmp.eq.s32.totalorder %s24_s23, 0  ;;  %p35_p2 = scmp.eq.s32.totalorder %s605_s18, 0 }
   0x9   : > { %p40_p3 = scmp.ne.s32.totalorder %s597_s16, %s593_s15  ;;  %p41_p4 = scmp.eq.s32.totalorder %s660_s19, 0 }
   0xa   : > { %s676_s24 = scalar_select %p25_p1, %s601_s17, %s27_s22  }
   0xb   : > { %p678_p5 = por %p35_p2, %p34_p0  ;;  %p682_p6 = por %p41_p4, %p40_p3 }
   0xc   : > { %p132_p7 = scmp.eq.s32.totalorder %s660_s19, 1  ;;  %p138_p8 = scmp.eq.s32.totalorder %s423_s20, 1 }
   0xd   : > { %s840_s26 = scalar_select %p682_p6, 1, 0 }
   0xe   : > { %p456_p10 = scmp.lt.s32.totalorder %s605_s18, 2  ;;  %p689_p11 = por %p132_p7, %p34_p0 }
   0xf   : > { %p693_p12 = por %p138_p8, %p40_p3  ;;  %s164_s29 = sand.u32 1, %s601_s17  }
  0x10   : > { %s841_s27 = scalar_select %p689_p11, 1, 0 }
  0x11   : > { %s842_s28 = scalar_select %p693_p12, 1, 0 }
  0x12   : > { %s442_s30 = sshll.u32 %s605_s18, 9  ;;  %s426_s5 = sshll.u32 %s164_s29, 5 }
  0x13   : > { %s702_s8 = scalar_lea.hbm %s832_s0, %s442_s30  ;;  %s168_s9 = scalar_lea.vmem [#allocation2], %s426_s5 }
  0x14   : > { %s175_s10 = sshll.u32 %s168_s9, 4  ;;  %p706_p13 = pnand %p456_p10, %p678_p5  ;;  %s710_s10 = int_to_ptr.vmem [resolvable:$true] %s175_s10 }
  0x15   : > { %s712_s12 = scalar_lea.sflag [#allocation3], %s164_s29  ;;  %s513_s13 = scalar_lea.hbm %s702_s8, 512 }
  0x16   : > { %p514_p0 = scmp.ne.s32.totalorder %s702_s8, %s513_s13  ;;  %p515_p1 = pneg %p706_p13 }
  0x17   : > { %s518_s22 = scalar_lea.hbm %s832_s0, 1024  ;;  %p519_p4 = scmp.lt.s32.totalorder %s702_s8, %s832_s0 }
  0x18   : > { %p516_p2 = pnand %p515_p1, %p514_p0  ;;  %p520_p5 = scmp.lt.s32.totalorder %s518_s22, %s513_s13 }
  0x1a   : > { %p517_p3 = pneg %p516_p2  ;;  %p521_p7 = por %p520_p5, %p519_p4 }
  0x1c   : > { %p522_p8 = pnand %p521_p7, %p517_p3 }
  0x1e   : > { %525 = shalt.err (!%p522_p8)
}
  0x1f   : > { %s526_s29 = scalar_lea.vmem %s710_s10, 512  ;;  %s607_s30 = smov [#allocation2]  }
  0x20   : > { %p527_p10 = scmp.ne.s32.totalorder %s710_s10, %s526_s29  ;;  %s531_s5 = sshll.u32 %s607_s30, 4  ;;  %s532_s5 = int_to_ptr.vmem [resolvable:$false] %s531_s5 }
  0x21   : > { %s533_s6 = scalar_lea.vmem %s532_s5, 1024  ;;  %p534_p2 = scmp.lt.s32.totalorder %s710_s10, %s532_s5 }
  0x22   : > { %p529_p9 = pnand %p527_p10, %p515_p1  ;;  %p535_p12 = scmp.lt.s32.totalorder %s533_s6, %s526_s29 }
  0x24   : > { %p530_p0 = pneg %p529_p9  ;;  %p536_p11 = por %p535_p12, %p534_p2 }
  0x26   : > { %p537_p6 = pnand %p536_p11, %p530_p0 }
  0x28   : > { %540 = shalt.err (!%p537_p6)
}
  0x29   : > { %s608_s7 = smov 256   ;;  %s609_s9 = smov 16  }
  0x2a   : > { %451 = dma.hbm_to_vmem [thread:$0]  (!%p706_p13), %s702_s8, 512, %s710_s10, %s712_s12, %s608_s7, %s608_s7, %s609_s9  }
  0x2b   : > { %p429_p9 = scmp.ge.s32.totalorder %s605_s18, 1  ;;  %p189_p1 = scmp.lt.s32.totalorder %s605_s18, 3 }
  0x2d   : > { %p190_p3 = pnand %p429_p9, %p189_p1 }
  0x2e   : > { %s736_s13 = sand.u32 (!%p190_p3), 1, %s597_s16   ;;  %p844_p6 = scmp.ne.s32.totalorder (!%p190_p3), %s840_s26, 0 }
  0x2f   : > { %193 = sbr.rel (%p190_p3) target bundleno = 386 (0x182), region = 36  ;;  %s430_s14 = sshll.u32 (!%p190_p3), %s736_s13, 5 }
  0x30   : > { %s196_s20 = scalar_lea.sflag (!%p190_p3), [#allocation3], %s736_s13  ;;  %s742_s22 = scalar_lea.vmem (!%p190_p3), [#allocation2], %s430_s14 }
  0x34   : > { %584 = dma.done.wait (%p844_p6), %s196_s20, 512  }
  0x35   : > { %586 = vsyncadd (%p844_p6), %s196_s20, 4294966784  ;;  %p227_p11 = scmp.lt.s32.totalorder %s660_s19, 1  ;;  %v237_v1 = vld [vmem:[%s834_s2 + $0x10] sm:$0xff]  ;;  %v235_v2 = vld [vmem:[%s834_s2] sm:$0xff]  ;;  %v610_v9 = vmov 0   ;;  %s226_s29 = scalar_lea.vmem [#allocation5], %s430_s14 }
  0x36   : > { %v238_v5 = vld [vmem:[%s834_s2 + $0x18] sm:$0xff]  ;;  %v236_v6 = vld [vmem:[%s834_s2 + $0x8] sm:$0xff]  ;;  %496 = vset.pattern.permute.xlu1 %v610_v9  ;;  %495 = vset.pattern.permute.xlu0 %v610_v9  ;;  %v259_v10 = vld [vmem:[%s835_s3 + $0x10] sm:$0xff]  ;;  %s341_s30 = sshll.u32 %s226_s29, 4  ;;  %s443_s26 = sshll.u32 %s660_s19, 9  ;;  %s784_s30 = int_to_ptr.vmem [resolvable:$true] %s341_s30 }
  0x37   : > { %s228_s8 = scalar_select %p227_p11, %s660_s19, 1  ;;  %v257_v11 = vld [vmem:[%s835_s3] sm:$0xff]  ;;  %v260_v16 = vld [vmem:[%s835_s3 + $0x18] sm:$0xff]  ;;  %v258_v17 = vld [vmem:[%s835_s3 + $0x8] sm:$0xff] }
  0x38   : > { %v230_v44 = vld [vmem:[%s742_s22] sm:$0xff]  ;;  %v231_v45 = vld [vmem:[%s742_s22 + $0x8] sm:$0xff]  ;;  %v232_v53 = vld [vmem:[%s742_s22 + $0x10] sm:$0xff]  ;;  %s789_s14 = scalar_lea.hbm %s836_s4, %s443_s26  ;;  %s541_s7 = scalar_lea.vmem %s784_s30, 512 }
  0x39   : > { %s229_s12 = scalar_lea.vmem %s833_s1, %s228_s8  ;;  %v233_v54 = vld [vmem:[%s742_s22 + $0x18] sm:$0xff]  ;;  %s328_s22 = scalar_lea.sflag [#allocation4], %s736_s13 }
  0x3a   : > { %v432_v0 = vld [vmem:[%s229_s12] ss:$0 sm:$0xff]  ;;  %p542_p12 = scmp.ne.s32.totalorder %s784_s30, %s541_s7  ;;  %p845_p13 = scmp.ne.s32.totalorder %s841_s27, 0 }
  0x3b   : > { %v247_v3 = vmul.f32 %v432_v0, %v237_v1  ;;  %v245_v4 = vmul.f32 %v432_v0, %v235_v2  ;;  %v248_v7 = vmul.f32 %v432_v0, %v238_v5  ;;  %v246_v8 = vmul.f32 %v432_v0, %v236_v6  ;;  %s611_s19 = smov [#allocation5]  }
  0x3c   : > { %p543_p4 = pnand %p542_p12, %p845_p13  ;;  %s545_s9 = sshll.u32 %s611_s19, 4  ;;  %s546_s9 = int_to_ptr.vmem [resolvable:$false] %s545_s9 }
  0x3d   : > { %253 = vadd.xlane.f32.xlu1 %v247_v3  ;;  %249 = vadd.xlane.f32.xlu0 %v245_v4  ;;  %s547_s20 = scalar_lea.vmem %s546_s9, 1024  ;;  %p548_p7 = scmp.lt.s32.totalorder %s784_s30, %s546_s9 }
  0x3e   : > { %p544_p5 = pneg %p543_p4  ;;  %p549_p8 = scmp.lt.s32.totalorder %s547_s20, %s541_s7 }
  0x40   : > { %p550_p10 = por %p549_p8, %p548_p7 }
  0x41   : > { %255 = vadd.xlane.f32.xlu1 %v248_v7  ;;  %251 = vadd.xlane.f32.xlu0 %v246_v8 }
  0x42   : > { %p551_p0 = pnand %p550_p10, %p544_p5 }
  0xc6   : > { %v254_v12 = vpop.xlane.xlu1 %253  ;;  %v250_v13 = vpop.xlane.xlu0 %249 }
  0xc7   : > { %v263_v14 = vadd.f32 %v259_v10, %v254_v12  ;;  %v261_v15 = vadd.f32 %v257_v11, %v250_v13 }
  0xc9   : > { %v435_v18 = vmul.f32 -1.442695, %v263_v14  ;;  %v433_v19 = vmul.f32 -1.442695, %v261_v15 }
  0xca   : > { %v256_v20 = vpop.xlane.xlu1 %255  ;;  %v252_v21 = vpop.xlane.xlu0 %251 }
  0xcb   : > { %497 = vpow2.f32 %v435_v18  ;;  %v264_v22 = vadd.f32 %v260_v16, %v256_v20  ;;  %v262_v23 = vadd.f32 %v258_v17, %v252_v21 }
  0xcc   : > { %499 = vpow2.f32 %v433_v19 }
  0xcd   : > { %v436_v24 = vmul.f32 -1.442695, %v264_v22  ;;  %v434_v25 = vmul.f32 -1.442695, %v262_v23 }
  0xcf   : > { %501 = vpow2.f32 %v436_v24 }
  0xd0   : > { %503 = vpow2.f32 %v434_v25 }
  0xd8   : > { %v498_v26 = vpop.eup %497 }
  0xd9   : > { %v500_v27 = vpop.eup %499  ;;  %v279_v28 = vadd.f32 1.0, %v498_v26 }
  0xda   : > { %v277_v29 = vadd.f32 1.0, %v500_v27 }
  0xdb   : > { %505 = vrcp.f32 %v279_v28 }
  0xdc   : > { %v502_v30 = vpop.eup %501  ;;  %507 = vrcp.f32 %v277_v29 }
  0xdd   : > { %v504_v31 = vpop.eup %503  ;;  %v280_v33 = vadd.f32 1.0, %v502_v30 }
  0xde   : > { %v278_v32 = vadd.f32 1.0, %v504_v31 }
  0xe0   : > { %509 = vrcp.f32 %v278_v32 }
  0xe1   : > { %511 = vrcp.f32 %v280_v33 }
  0xe8   : > { %v506_v34 = vpop.eup %505 }
  0xe9   : > { %v508_v35 = vpop.eup %507  ;;  %v291_v36 = vmul.f32 %v506_v34, %v263_v14 }
  0xea   : > { %v289_v37 = vmul.f32 %v508_v35, %v261_v15 }
  0xeb   : > { %311 = vperm.xlu1 %496, %v291_v36  }
  0xec   : > { %v293_v38 = vadd.f32 1.0, %v289_v37 }
  0xed   : > { %v510_v39 = vpop.eup %509 }
  0xee   : > { %v290_v40 = vmul.f32 %v510_v39, %v262_v23  ;;  %297 = vperm.xlu0 %495, %v293_v38   ;;  %v512_v42 = vpop.eup %511 }
  0xef   : > { %v292_v43 = vmul.f32 %v512_v42, %v264_v22 }
  0xf0   : > { %v294_v41 = vadd.f32 1.0, %v290_v40 }
  0xf2   : > { %302 = vperm.xlu1 %496, %v294_v41  }
  0xf6   : > { %316 = vperm.xlu1 %496, %v292_v43  }
 0x166   : > { %v312_v46 = vpop.permute.xlu1 %311 }
 0x169   : > { %v298_v47 = vpop.permute.xlu0 %297 }
 0x16a   : > { %v305_v48 = vmul.f32 %v298_v47, %v230_v44  ;;  %v306_v49 = vmul.f32 %v298_v47, %v231_v45 }
 0x16c   : > { %v319_v50 = vadd.f32 %v312_v46, %v305_v48  ;;  %v320_v51 = vadd.f32 %v312_v46, %v306_v49 }
 0x16d   : > { %v303_v52 = vpop.permute.xlu1 %302 }
 0x16e   : > { %323 = vst [vmem:[%s226_s29] sm:$0xff] %v319_v50  ;;  %324 = vst [vmem:[%s226_s29 + $0x8] sm:$0xff] %v320_v51  ;;  %v307_v55 = vmul.f32 %v303_v52, %v232_v53  ;;  %v308_v56 = vmul.f32 %v303_v52, %v233_v54 }
 0x171   : > { %v317_v57 = vpop.permute.xlu1 %316 }
 0x172   : > { %v321_v58 = vadd.f32 %v317_v57, %v307_v55  ;;  %v322_v59 = vadd.f32 %v317_v57, %v308_v56 }
 0x174   : > { %325 = vst [vmem:[%s226_s29 + $0x10] sm:$0xff] %v321_v58  ;;  %326 = vst [vmem:[%s226_s29 + $0x18] sm:$0xff] %v322_v59 }
 0x175   : > { %554 = shalt.err (!%p551_p0)
}
 0x176   : > { %s555_s8 = scalar_lea.hbm %s789_s14, 512  ;;  %s559_s12 = scalar_lea.hbm %s836_s4, 1024 }
 0x177   : > { %p556_p2 = scmp.ne.s32.totalorder %s789_s14, %s555_s8  ;;  %p560_p3 = scmp.lt.s32.totalorder %s789_s14, %s836_s4 }
 0x178   : > { %p561_p6 = scmp.lt.s32.totalorder %s559_s12, %s555_s8 }
 0x179   : > { %p557_p9 = pnand %p556_p2, %p845_p13 }
 0x17a   : > { %p562_p11 = por %p561_p6, %p560_p3 }
 0x17b   : > { %p558_p1 = pneg %p557_p9 }
 0x17d   : > { %p563_p12 = pnand %p562_p11, %p558_p1 }
 0x17f   : > { %566 = shalt.err (!%p563_p12)
}
 0x180   : > { %s612_s29 = smov 256   ;;  %s613_s26 = smov 16  }
 0x181   : > { %446 = dma.vmem_to_hbm [thread:$0]  (%p845_p13), %s784_s30, 512, %s789_s14, %s328_s22, %s612_s29, %s612_s29, %s613_s26  }
 0x182 PF: > { %s356_s5 = sand.u32 1, %s593_s15   ;;  %p846_p4 = scmp.ne.s32.totalorder %s842_s28, 0 }
 0x183   : > { %p847_p5 = scmp.ge.s32.totalorder %s605_s18, 2  ;;  %s357_s6 = scalar_lea.sflag [#allocation4], %s356_s5 }
 0x185   : > { %p453_p7 = pnand %p847_p5, %p846_p4 }
 0x187   : > { %p454_p8 = pneg %p453_p7 }
 0x189   : > { %588 = dma.done.wait (%p454_p8), %s357_s6, 512  }
 0x18a   : > { %590 = vsyncadd (%p454_p8), %s357_s6, 4294966784  ;;  %p17_p10 = scmp.ge.s32.totalorder %s664_s21, 4   ;;  %s848_s15 = smov %s597_s16 }
 0x18b   : > { %s849_s16 = smov %s601_s17  ;;  %s850_s17 = smov %s676_s24 }
 0x18c   : > { %s851_s18 = smov %s664_s21  ;;  %19 = sbr.rel (!%p17_p10) target bundleno = 5 (0x5), region = 84 }
 0x191   :  { %362 = vsyncpa [#allocation3], 1 }
 0x192   :  { %364 = vsyncpa [#allocation3 + $0x1], 1 }
 0x193   :  { %365 = vsyncpa [#allocation4], 1 }
 0x194   :  { %367 = vsyncpa [#allocation4 + $0x1], 1 }

</bundles_post_ra>
